<compile_context>
chip_gen: v7x
topology: tpu7x:2x2x1
jax: 0.10.0
libtpu: 0.0.40
codegen_flags: <defaults>
</compile_context>

<pallas_src>
import jax
import jax.numpy as jnp
from jax.experimental import pallas as pl
from jax.experimental.pallas import tpu as pltpu

IN_FEATURES = 2
OUT_FEATURES = 1
TILE_B = 512  # lane-dense batch tile (multiple of 128); tiny VMEM footprint


def linear_kernel(params_ref, x_ref, o_ref):
    # params_ref: SMEM (3,) f32 = [w0, w1, b]
    # x_ref:      VMEM (2, TILE_B) f32, feature-major
    # o_ref:      VMEM (1, TILE_B) f32
    w0 = params_ref[0]
    w1 = params_ref[1]
    b = params_ref[2]
    x0 = x_ref[0:1, :]  # (1, TILE_B)
    x1 = x_ref[1:2, :]  # (1, TILE_B)
    # Pure VPU FMA in f32 (no MXU, no bf16 intermediates -> also fast on v5e).
    o_ref[...] = x0 * w0 + x1 * w1 + b


def linear_forward(x, weight, bias):
    """x: (B, 2) f32; weight: (1, 2) f32; bias: (1,) f32 -> (B, 1) f32."""
    B = x.shape[0]
    n_tiles = pl.cdiv(B, TILE_B)
    Bp = n_tiles * TILE_B

    # Weights + bias flattened into one tiny SMEM scalar vector.
    params = jnp.concatenate(
        [weight.reshape(-1), bias.reshape(-1)]
    ).astype(jnp.float32)  # (3,)

    # Feature-major, lane-dense view of x; pad batch up to a tile multiple.
    xt = x.T  # (2, B)
    if Bp != B:
        xt = jnp.pad(xt, ((0, 0), (0, Bp - B)))

    out = pl.pallas_call(
        linear_kernel,
        out_shape=jax.ShapeDtypeStruct((OUT_FEATURES, Bp), jnp.float32),
        grid_spec=pl.GridSpec(
            grid=(n_tiles,),
            in_specs=[
                # Scalars live in SMEM, passed whole to every grid step.
                pl.BlockSpec(memory_space=pltpu.MemorySpace.SMEM),
                # x block: full feature dim (2), lane-dense batch tile.
                pl.BlockSpec((IN_FEATURES, TILE_B), lambda i: (0, i)),
            ],
            out_specs=pl.BlockSpec((OUT_FEATURES, TILE_B), lambda i: (0, i)),
        ),
        compiler_params=pltpu.CompilerParams(
            dimension_semantics=("parallel",),
        ),
        cost_estimate=pl.CostEstimate(
            flops=4 * B,            # 2 mul + 2 add per row
            transcendentals=0,
            bytes_accessed=12 * B + 12,  # read 2 f32 + write 1 f32 per row
        ),
    )(params, xt)

    # Back to PyTorch's (B, 1) convention; drop batch padding.
    return out[:, :B].reshape(B, OUT_FEATURES)


if __name__ == "__main__":
    key = jax.random.PRNGKey(0)
    k_x, k_w, k_b = jax.random.split(key, 3)

    # Deterministic parameter init (mimics nn.Linear's U(-1/sqrt(in), 1/sqrt(in)))
    bound = 1.0 / jnp.sqrt(jnp.float32(IN_FEATURES))
    weight = jax.random.uniform(
        k_w, (OUT_FEATURES, IN_FEATURES), jnp.float32, -bound, bound
    )
    bias = jax.random.uniform(k_b, (OUT_FEATURES,), jnp.float32, -bound, bound)

    # Small example input: batch=8 rows of 2 features
    B = 8
    x = jax.random.normal(k_x, (B, IN_FEATURES), jnp.float32)

    out = linear_forward(x, weight, bias)
    out = jax.block_until_ready(out)

    # Reference check (plain JAX)
    ref = x @ weight.T + bias
    assert out.shape == (B, OUT_FEATURES)
    assert jnp.allclose(out, ref, atol=1e-5, rtol=1e-5)

    print("KERNEL_OK")
</pallas_src>

<mosaic_0001>
module attributes {stable_mosaic.version = 11 : i64} {
  func.func @linear_kernel(%arg0: i32, %arg1: memref<3xf32, #tpu.memory_space<smem>>, %arg2: memref<2x512xf32, #tpu.memory_space<vmem>>, %arg3: memref<1x512xf32, #tpu.memory_space<vmem>>) attributes {dimension_semantics = [#tpu.dimension_semantics<parallel>], iteration_bounds = array<i64: 1>, scalar_prefetch = 0 : i64, scratch_operands = 0 : i64, tpu.core_type = #tpu.core_type<tc>, window_params = [{transform_indices = @transform_0, window_bounds = array<i64: 3>}, {transform_indices = @transform_1, window_bounds = array<i64: 2, 512>}, {transform_indices = @transform_2, window_bounds = array<i64: 1, 512>}]} {
    %c0 = arith.constant 0 : index
    %0 = memref.load %arg1[%c0] : memref<3xf32, #tpu.memory_space<smem>>
    %c1 = arith.constant 1 : index
    %1 = memref.load %arg1[%c1] : memref<3xf32, #tpu.memory_space<smem>>
    %c2 = arith.constant 2 : index
    %2 = memref.load %arg1[%c2] : memref<3xf32, #tpu.memory_space<smem>>
    %c0_0 = arith.constant 0 : index
    %c0_1 = arith.constant 0 : index
    %3 = vector.load %arg2[%c0_0, %c0_1] : memref<2x512xf32, #tpu.memory_space<vmem>>, vector<1x512xf32>
    %c1_2 = arith.constant 1 : index
    %c0_3 = arith.constant 0 : index
    %4 = vector.load %arg2[%c1_2, %c0_3] : memref<2x512xf32, #tpu.memory_space<vmem>>, vector<1x512xf32>
    %5 = vector.broadcast %0 : f32 to vector<1x512xf32>
    %6 = arith.mulf %3, %5 : vector<1x512xf32>
    %7 = vector.broadcast %1 : f32 to vector<1x512xf32>
    %8 = arith.mulf %4, %7 : vector<1x512xf32>
    %9 = arith.addf %6, %8 : vector<1x512xf32>
    %10 = vector.broadcast %2 : f32 to vector<1x512xf32>
    %11 = arith.addf %9, %10 : vector<1x512xf32>
    %c0_4 = arith.constant 0 : index
    %c0_5 = arith.constant 0 : index
    %12 = vector.load %arg3[%c0_4, %c0_5] : memref<1x512xf32, #tpu.memory_space<vmem>>, vector<1x512xf32>
    tpu.vector_store %arg3[%c0_4, %c0_5], %11 {strides = array<i32>} : memref<1x512xf32, #tpu.memory_space<vmem>>, vector<1x512xf32>,
    return
  }
  func.func @transform_0(%arg0: i32) -> i32 {
    %c0_i32 = arith.constant 0 : i32
    %c0_i32_0 = arith.constant 0 : i32
    return %c0_i32 : i32
  }
  func.func @transform_1(%arg0: i32) -> (i32, i32) {
    %c0_i32 = arith.constant 0 : i32
    %c0_i32_0 = arith.constant 0 : i32
    return %c0_i32, %arg0 : i32, i32
  }
  func.func @transform_2(%arg0: i32) -> (i32, i32) {
    %c0_i32 = arith.constant 0 : i32
    %c0_i32_0 = arith.constant 0 : i32
    return %c0_i32, %arg0 : i32, i32
  }
}

</mosaic_0001>

<bundles_post_ra>
// kernel: tpu_custom_call.1
= control target key start
LH: loop header
LB: loop body
LE: loop exit
PB: predicated region body
PF: predicated region fallthrough
CT: control target
= control target key end

     0   :  { %7 = vsyncpa [#allocation5], 0  ;;  %s188_s0 = inlined_call_operand.hbm [shape: f32[3], index: 0, kind: input, shape index: {}]   ;;  %s189_s1 = inlined_call_operand.hbm [shape: f32[2,512], index: 1, kind: input, shape index: {}]   ;;  %s190_s2 = inlined_call_operand.hbm [shape: f32[1,512], index: 2, kind: output, shape index: {}]  }
   0x1   :  { %8 = vsyncpa [#allocation3], 0 }
   0x2   :  { %9 = vsyncpa [#allocation4], 0  ;;  %s74_s11 = scalar_lea.hbm %s188_s0, 16 }
   0x3   :  { %p75_p0 = scmp.ne.s32.totalorder %s188_s0, %s74_s11  ;;  %p78_p1 = scmp.lt.u32.totalorder %s74_s11, %s188_s0 }
   0x5   :  { %p80_p2 = pnand %p78_p1, %p75_p0 }
   0x7   :  { %83 = shalt.err (!%p80_p2)
}
   0x8   :  { %s134_s16 = smov [#allocation2]   ;;  %s135_s19 = smov [#allocation6]  }
   0x9   :  { %17 = dma.hbm_to_smem %s188_s0, 16, %s134_s16, [#allocation5]  }
   0xa   :  { %s24_s20 = sshll.u32 %s135_s19, 4  ;;  %s84_s23 = scalar_lea.hbm %s189_s1, 128  ;;  %s25_s20 = int_to_ptr.vmem [resolvable:$true] %s24_s20 }
   0xb   :  { %p85_p3 = scmp.ne.s32.totalorder %s189_s1, %s84_s23  ;;  %p88_p4 = scmp.lt.u32.totalorder %s84_s23, %s189_s1 }
   0xd   :  { %p90_p5 = pnand %p88_p4, %p85_p3 }
   0xf   :  { %93 = shalt.err (!%p90_p5)
}
  0x10   :  { %s94_s28 = scalar_lea.vmem %s25_s20, 128  ;;  %p99_p7 = scmp.lt.s32.totalorder %s25_s20, %s25_s20 }
  0x11   :  { %p95_p6 = scmp.ne.s32.totalorder %s25_s20, %s94_s28  ;;  %p100_p8 = scmp.lt.s32.totalorder %s94_s28, %s94_s28 }
  0x13   :  { %p101_p9 = por %p100_p8, %p99_p7 }
  0x15   :  { %p102_p10 = pnand %p101_p9, %p95_p6 }
  0x17   :  { %105 = shalt.err (!%p102_p10)
}
  0x18   :  { %27 = dma.hbm_to_vmem [thread:$0]  %s189_s1, 128, %s25_s20, [#allocation3]  }
  0x19   :  { %128 = dma.done.wait [#allocation5], 16  }
  0x1a   :  { %129 = vsyncadd [#allocation5], 4294967280 }
  0x1b   :  { %130 = dma.done.wait [#allocation3], 128  }
  0x1c   :  { %131 = vsyncadd [#allocation3], 4294967168 }
  0x1d   :  { %34 = sfence }
  0x1e   :  { %s35_s30 = sld [smem:[#allocation2]]  ;;  %s69_s3 = sld [smem:[#allocation2 + $0x1]]  ;;  %v38_v0 = vld [vmem:[#allocation6] ss:$2 sm:$0xf]  ;;  %v48_v4 = vlaneseq }
  0x1f   :  { %s70_s4 = sld [smem:[#allocation2 + $0x2]]  ;;  %v40_v1 = vld [vmem:[#allocation6 + $0x1] ss:$2 sm:$0xf]  ;;  %s136_s5 = smov [#allocation7]  }
  0x20   :  { %s59_s6 = sshll.u32 %s136_s5, 4  ;;  %vm50_vm0 = vcmp.lt.s32.totalorder %v48_v4, 512  ;;  %s60_s6 = int_to_ptr.vmem [resolvable:$true] %s59_s6 }
  0x21   :  { %s106_s1 = scalar_lea.vmem %s60_s6, 64  ;;  %p111_p12 = scmp.lt.s32.totalorder %s60_s6, %s60_s6 }
  0x22   :  { %p107_p11 = scmp.ne.s32.totalorder %s60_s6, %s106_s1  ;;  %p112_p13 = scmp.lt.s32.totalorder %s106_s1, %s106_s1 }
  0x24   :  { %v41_v2 = vstv %s35_s30  ;;  %v43_v3 = vstv %s69_s3  ;;  %p113_p0 = por %p112_p13, %p111_p12 }
  0x25   :  { %v42_v5 = vmul.f32 %v41_v2, %v38_v0  ;;  %v44_v6 = vmul.f32 %v43_v3, %v40_v1  ;;  %v46_v7 = vstv %s70_s4 }
  0x26   :  { %p114_p1 = pnand %p113_p0, %p107_p11 }
  0x27   :  { %v45_v8 = vadd.f32 %v44_v6, %v42_v5 }
  0x29   :  { %v47_v9 = vadd.f32 %v46_v7, %v45_v8 }
  0x2b   :  { %52 = vst.msk [vmem:[#allocation7] sm:$0xf] %vm50_vm0, %v47_v9 }
  0x2c   :  { %117 = shalt.err (!%p114_p1)
}
  0x2d   :  { %s118_s9 = scalar_lea.hbm %s190_s2, 64 }
  0x2e   :  { %p119_p2 = scmp.ne.s32.totalorder %s190_s2, %s118_s9  ;;  %p122_p3 = scmp.lt.u32.totalorder %s118_s9, %s190_s2 }
  0x30   :  { %p124_p4 = pnand %p122_p3, %p119_p2 }
  0x32   :  { %127 = shalt.err (!%p124_p4)
}
  0x33   :  { %62 = dma.vmem_to_hbm [thread:$0]  %s60_s6, 64, %s190_s2, [#allocation4]  }
  0x34   :  { %132 = dma.done.wait [#allocation4], 64  }
  0x35   :  { %133 = vsyncadd [#allocation4], 4294967232 }
  0x36   :  { %66 = vsyncpa [#allocation3], 1 }
  0x37   :  { %67 = vsyncpa [#allocation4], 1 }
  0x38   :  { %68 = vsyncpa [#allocation5], 1 }

</bundles_post_ra>
